<compile_context>
chip_gen: v7x
topology: tpu7x:2x2x1
jax: 0.10.0
libtpu: 0.0.40
codegen_flags: <defaults>
</compile_context>

<pallas_src>
import numpy as np
import jax
import jax.numpy as jnp
from jax.experimental import pallas as pl
from jax.experimental.pallas import tpu as pltpu

NUM_CLASSES = 8                 # model.num_classes
C_IN = 3                        # RGB input channels
C_FEAT = 32                     # backbone feature channels
K_RAW = 9 * C_IN                # 27 = im2col contraction width
K_PAD = 32                      # padded contraction width (alignment)
HEAD_RAW = NUM_CLASSES + 5      # cls(8) + bbox_reg(4) + centerness(1) = 13
HEAD_PAD = 16                   # padded head width (alignment)
STRIDE = 2.0                    # backbone stride -> anchor stride
ANCHOR_SIZE = 8.0               # single square anchor per feature location
TILE_MAX = 512                  # anchors per grid step (lane axis), mult of 128
SCORE_THRESH = 0.01


# ----------------------------------------------------------------------------
# Fused Pallas kernel (anchors on the lane axis)
# ----------------------------------------------------------------------------
def fused_kernel(patches_ref, centers_ref, w_bb_ref, b_bb_ref,
                 w_head_ref, b_head_ref,
                 boxes_ref, scores_ref, maxsc_ref, labels_ref):
    # Backbone: (C_FEAT, K_PAD) @ (K_PAD, T) -> (C_FEAT, T), bias + ReLU.
    feat = jnp.maximum(
        jnp.dot(w_bb_ref[...], patches_ref[...],
                preferred_element_type=jnp.float32) + b_bb_ref[...],
        0.0)

    # Detection head (1x1 conv): (HEAD_PAD, C_FEAT) @ (C_FEAT, T) -> (HEAD_PAD, T)
    head = jnp.dot(w_head_ref[...], feat,
                   preferred_element_type=jnp.float32) + b_head_ref[...]
    cls_t = head[0:NUM_CLASSES, :]                       # (8, T)
    reg_t = head[NUM_CLASSES:NUM_CLASSES + 4, :]         # (4, T)
    ctr_t = head[NUM_CLASSES + 4:NUM_CLASSES + 5, :]     # (1, T)

    # decode_boxes with fixed square anchors (width == height == ANCHOR_SIZE).
    cx = centers_ref[0:1, :]
    cy = centers_ref[1:2, :]
    # NOTE: deltas are multiplied by the anchor size BEFORE exp(), exactly as
    # the PyTorch HybridDetectionModel.decode_boxes does.
    dx = reg_t[0:1, :] * ANCHOR_SIZE
    dy = reg_t[1:2, :] * ANCHOR_SIZE
    dw = reg_t[2:3, :] * ANCHOR_SIZE
    dh = reg_t[3:4, :] * ANCHOR_SIZE
    pcx = cx + dx
    pcy = cy + dy
    pw = jnp.exp(dw) * ANCHOR_SIZE
    ph = jnp.exp(dh) * ANCHOR_SIZE
    boxes_ref[...] = jnp.concatenate(
        [pcx - 0.5 * pw, pcy - 0.5 * ph, pcx + 0.5 * pw, pcy + 0.5 * ph],
        axis=0)                                          # (4, T) lane-dense

    # scores = sigmoid(cls) * sigmoid(centerness); per-anchor max / argmax.
    scores = jax.nn.sigmoid(cls_t) * jax.nn.sigmoid(ctr_t)
    scores_ref[...] = scores
    m = jnp.max(scores, axis=0, keepdims=True)
    maxsc_ref[...] = m
    row = jax.lax.broadcasted_iota(jnp.int32, scores.shape, 0).astype(jnp.float32)
    labels_ref[...] = jnp.min(
        jnp.where(scores == m, row, float(NUM_CLASSES)),
        axis=0, keepdims=True).astype(jnp.int32)


def fused_forward(patches_t, centers_t, w_bb_t, b_bb_t, w_head_t, b_head_t, tile):
    k_pad, n_pad = patches_t.shape
    grid = (n_pad // tile,)
    return pl.pallas_call(
        fused_kernel,
        out_shape=(jax.ShapeDtypeStruct((4, n_pad), jnp.float32),
                   jax.ShapeDtypeStruct((NUM_CLASSES, n_pad), jnp.float32),
                   jax.ShapeDtypeStruct((1, n_pad), jnp.float32),
                   jax.ShapeDtypeStruct((1, n_pad), jnp.int32)),
        grid=grid,
        in_specs=[pl.BlockSpec((k_pad, tile), lambda i: (0, i)),
                  pl.BlockSpec((2, tile), lambda i: (0, i)),
                  pl.BlockSpec((C_FEAT, K_PAD), lambda i: (0, 0)),
                  pl.BlockSpec((C_FEAT, 1), lambda i: (0, 0)),
                  pl.BlockSpec((HEAD_PAD, C_FEAT), lambda i: (0, 0)),
                  pl.BlockSpec((HEAD_PAD, 1), lambda i: (0, 0))],
        out_specs=(pl.BlockSpec((4, tile), lambda i: (0, i)),
                   pl.BlockSpec((NUM_CLASSES, tile), lambda i: (0, i)),
                   pl.BlockSpec((1, tile), lambda i: (0, i)),
                   pl.BlockSpec((1, tile), lambda i: (0, i))),
        compiler_params=pltpu.CompilerParams(
            dimension_semantics=("parallel",)),
    )(patches_t, centers_t, w_bb_t, b_bb_t, w_head_t, b_head_t)


# ----------------------------------------------------------------------------
# JAX glue (layout plumbing, parameter setup, anchor centers)
# ----------------------------------------------------------------------------
def _round_up(x, m):
    return (x + m - 1) // m * m


def im2col_3x3_s2(x_nhwc):
    B, H, W, C = x_nhwc.shape
    Ho, Wo = H // 2, W // 2
    xp = jnp.pad(x_nhwc, ((0, 0), (1, 1), (1, 1), (0, 0)))
    cols = []
    for dy in range(3):
        for dx in range(3):
            cols.append(xp[:, dy:dy + 2 * Ho:2, dx:dx + 2 * Wo:2, :])
    patches = jnp.concatenate(cols, axis=-1)            # (B, Ho, Wo, 9*C)
    return patches.reshape(B * Ho * Wo, 9 * C), (B, Ho, Wo)


def make_centers(B, Ho, Wo, stride=STRIDE):
    ys = (jnp.arange(Ho, dtype=jnp.float32) + 0.5) * stride
    xs = (jnp.arange(Wo, dtype=jnp.float32) + 0.5) * stride
    cy, cx = jnp.meshgrid(ys, xs, indexing="ij")
    cx = jnp.tile(cx.reshape(-1), B)
    cy = jnp.tile(cy.reshape(-1), B)
    return jnp.stack([cx, cy], axis=0)                  # (2, B*Ho*Wo)


def make_anchors(Ho, Wo, stride=STRIDE, size=ANCHOR_SIZE):
    ys = (jnp.arange(Ho, dtype=jnp.float32) + 0.5) * stride
    xs = (jnp.arange(Wo, dtype=jnp.float32) + 0.5) * stride
    cy, cx = jnp.meshgrid(ys, xs, indexing="ij")
    cx, cy = cx.reshape(-1), cy.reshape(-1)
    half = size / 2.0
    return jnp.stack([cx - half, cy - half, cx + half, cy + half], axis=1)


def init_params(key):
    k1, k2 = jax.random.split(key, 2)
    w_bb = jax.random.normal(k1, (3, 3, C_IN, C_FEAT), jnp.float32) / np.sqrt(9 * C_IN)
    b_bb = jnp.zeros((1, C_FEAT), jnp.float32)
    w_head = jax.random.normal(k2, (C_FEAT, HEAD_RAW), jnp.float32) / np.sqrt(C_FEAT)
    b_head = jnp.zeros((1, HEAD_RAW), jnp.float32)
    return {"w_bb": w_bb, "b_bb": b_bb, "w_head": w_head, "b_head": b_head}


def prepare_params_t(params):
    """Transpose + zero-pad weights into the lane-dense kernel layout."""
    w_bb = params["w_bb"].reshape(K_RAW, C_FEAT)                     # (27, 32)
    w_bb_t = jnp.zeros((C_FEAT, K_PAD), jnp.float32).at[:, :K_RAW].set(w_bb.T)
    b_bb_t = params["b_bb"].reshape(C_FEAT, 1)
    w_head_t = jnp.zeros((HEAD_PAD, C_FEAT), jnp.float32) \
        .at[:HEAD_RAW, :].set(params["w_head"].T)                    # (16, 32)
    b_head_t = jnp.zeros((HEAD_PAD, 1), jnp.float32) \
        .at[:HEAD_RAW, :].set(params["b_head"].reshape(HEAD_RAW, 1))
    return w_bb_t, b_bb_t, w_head_t, b_head_t


def hybrid_detection_forward(images_nchw, params):
    """Inference path of HybridDetectionModel.forward (post_process branch)."""
    x = jnp.transpose(images_nchw, (0, 2, 3, 1))                     # NCHW -> NHWC
    patches, (B, Ho, Wo) = im2col_3x3_s2(x)                          # (N, 27)
    N = B * Ho * Wo
    HW = Ho * Wo

    tile = min(TILE_MAX, _round_up(N, 128))
    n_pad = _round_up(N, tile)

    # Lane-major (anchors on lane axis), contraction dim padded to 32.
    patches_t = jnp.zeros((K_PAD, n_pad), jnp.float32).at[:K_RAW, :N].set(patches.T)
    centers_t = jnp.zeros((2, n_pad), jnp.float32).at[:, :N].set(make_centers(B, Ho, Wo))
    w_bb_t, b_bb_t, w_head_t, b_head_t = prepare_params_t(params)

    boxes_t, scores_t, maxsc_t, labels_t = fused_forward(
        patches_t, centers_t, w_bb_t, b_bb_t, w_head_t, b_head_t, tile)

    boxes = boxes_t[:, :N].T.reshape(B, HW, 4)
    scores = scores_t[:, :N].T.reshape(B, HW, NUM_CLASSES)
    max_scores = maxsc_t[0, :N].reshape(B, HW)
    labels = labels_t[0, :N].reshape(B, HW)
    keep_mask = max_scores > SCORE_THRESH
    return {"boxes": boxes, "scores": scores, "max_scores": max_scores,
            "labels": labels, "keep_mask": keep_mask}


def reference_forward(images_nchw, params):
    """Pure-JAX reference of the same forward pass (correctness check)."""
    x = jnp.transpose(images_nchw, (0, 2, 3, 1))
    patches, (B, Ho, Wo) = im2col_3x3_s2(x)
    feat = jnp.maximum(patches @ params["w_bb"].reshape(K_RAW, C_FEAT)
                       + params["b_bb"], 0.0)
    head = feat @ params["w_head"] + params["b_head"]
    cls = head[:, :NUM_CLASSES]
    reg = head[:, NUM_CLASSES:NUM_CLASSES + 4]
    ctr = head[:, NUM_CLASSES + 4:NUM_CLASSES + 5]
    anc = jnp.tile(make_anchors(Ho, Wo), (B, 1))
    w = anc[:, 2] - anc[:, 0]
    h = anc[:, 3] - anc[:, 1]
    cx = anc[:, 0] + 0.5 * w
    cy = anc[:, 1] + 0.5 * h
    pcx = cx + reg[:, 0] * w
    pcy = cy + reg[:, 1] * h
    pw = jnp.exp(reg[:, 2] * w) * w
    ph = jnp.exp(reg[:, 3] * h) * h
    boxes = jnp.stack([pcx - 0.5 * pw, pcy - 0.5 * ph,
                       pcx + 0.5 * pw, pcy + 0.5 * ph], axis=1)
    scores = jax.nn.sigmoid(cls) * jax.nn.sigmoid(ctr)
    return boxes, scores


if __name__ == "__main__":
    key = jax.random.PRNGKey(0)
    pkey, xkey = jax.random.split(key)
    params = init_params(pkey)

    # images: batch=2, channels=3, spatial=16x16 (NCHW, like PyTorch)
    images = jax.random.normal(xkey, (2, C_IN, 16, 16), jnp.float32)

    fwd = jax.jit(hybrid_detection_forward)
    out = jax.block_until_ready(fwd(images, params))

    ref_boxes, ref_scores = reference_forward(images, params)
    B, HW = out["max_scores"].shape
    kb = np.asarray(out["boxes"]).reshape(B * HW, 4)
    ks = np.asarray(out["scores"]).reshape(B * HW, NUM_CLASSES)
    rb = np.asarray(ref_boxes)
    rs = np.asarray(ref_scores)

    assert np.allclose(kb, rb, rtol=2e-3, atol=1e-3), float(np.max(np.abs(kb - rb)))
    assert np.allclose(ks, rs, rtol=1e-3, atol=1e-5)
    assert np.allclose(np.asarray(out["max_scores"]).reshape(-1),
                       rs.max(axis=1), rtol=1e-3, atol=1e-5)
    assert np.array_equal(np.asarray(out["labels"]).reshape(-1),
                          rs.argmax(axis=1))

    print("KERNEL_OK")
</pallas_src>

<mosaic_0001>
module attributes {stable_mosaic.version = 11 : i64} {
  func.func @fused_kernel(%arg0: i32, %arg1: memref<32x128xf32, #tpu.memory_space<vmem>>, %arg2: memref<2x128xf32, #tpu.memory_space<vmem>>, %arg3: memref<32x32xf32, #tpu.memory_space<vmem>>, %arg4: memref<32x1xf32, #tpu.memory_space<vmem>>, %arg5: memref<16x32xf32, #tpu.memory_space<vmem>>, %arg6: memref<16x1xf32, #tpu.memory_space<vmem>>, %arg7: memref<4x128xf32, #tpu.memory_space<vmem>>, %arg8: memref<8x128xf32, #tpu.memory_space<vmem>>, %arg9: memref<1x128xf32, #tpu.memory_space<vmem>>, %arg10: memref<1x128xi32, #tpu.memory_space<vmem>>) attributes {dimension_semantics = [#tpu.dimension_semantics<parallel>], iteration_bounds = array<i64: 1>, scalar_prefetch = 0 : i64, scratch_operands = 0 : i64, tpu.core_type = #tpu.core_type<tc>, window_params = [{transform_indices = @transform_0, window_bounds = array<i64: 32, 128>}, {transform_indices = @transform_1, window_bounds = array<i64: 2, 128>}, {pipeline_mode = #tpu.pipeline_mode<synchronous>, transform_indices = @transform_2, window_bounds = array<i64: 32, 32>}, {pipeline_mode = #tpu.pipeline_mode<synchronous>, transform_indices = @transform_3, window_bounds = array<i64: 32, 1>}, {pipeline_mode = #tpu.pipeline_mode<synchronous>, transform_indices = @transform_4, window_bounds = array<i64: 16, 32>}, {pipeline_mode = #tpu.pipeline_mode<synchronous>, transform_indices = @transform_5, window_bounds = array<i64: 16, 1>}, {transform_indices = @transform_6, window_bounds = array<i64: 4, 128>}, {transform_indices = @transform_7, window_bounds = array<i64: 8, 128>}, {transform_indices = @transform_8, window_bounds = array<i64: 1, 128>}, {transform_indices = @transform_9, window_bounds = array<i64: 1, 128>}]} {
    %c0 = arith.constant 0 : index
    %c0_0 = arith.constant 0 : index
    %0 = vector.load %arg3[%c0, %c0_0] : memref<32x32xf32, #tpu.memory_space<vmem>>, vector<32x32xf32>
    %c0_1 = arith.constant 0 : index
    %c0_2 = arith.constant 0 : index
    %1 = vector.load %arg1[%c0_1, %c0_2] : memref<32x128xf32, #tpu.memory_space<vmem>>, vector<32x128xf32>
    %cst = arith.constant dense<0.000000e+00> : vector<32x128xf32>
    %2 = tpu.matmul %0, %1, %cst {dimension_numbers = #tpu.dot_dimension_numbers<[1], [0], [0], [1], [0, 0, 1, 1], [], []>} : vector<32x32xf32>, vector<32x128xf32>, vector<32x128xf32> -> vector<32x128xf32>
    %c0_3 = arith.constant 0 : index
    %c0_4 = arith.constant 0 : index
    %3 = vector.load %arg4[%c0_3, %c0_4] : memref<32x1xf32, #tpu.memory_space<vmem>>, vector<32x1xf32>
    %4 = vector.broadcast %3 : vector<32x1xf32> to vector<32x128xf32>
    %5 = arith.addf %2, %4 : vector<32x128xf32>
    %cst_5 = arith.constant 0.000000e+00 : f32
    %6 = vector.broadcast %cst_5 : f32 to vector<32x128xf32>
    %7 = arith.maximumf %5, %6 : vector<32x128xf32>
    %c0_6 = arith.constant 0 : index
    %c0_7 = arith.constant 0 : index
    %8 = vector.load %arg5[%c0_6, %c0_7] : memref<16x32xf32, #tpu.memory_space<vmem>>, vector<16x32xf32>
    %cst_8 = arith.constant dense<0.000000e+00> : vector<16x128xf32>
    %9 = tpu.matmul %8, %7, %cst_8 {dimension_numbers = #tpu.dot_dimension_numbers<[1], [0], [0], [1], [0, 0, 1, 1], [], []>} : vector<16x32xf32>, vector<32x128xf32>, vector<16x128xf32> -> vector<16x128xf32>
    %c0_9 = arith.constant 0 : index
    %c0_10 = arith.constant 0 : index
    %10 = vector.load %arg6[%c0_9, %c0_10] : memref<16x1xf32, #tpu.memory_space<vmem>>, vector<16x1xf32>
    %11 = vector.broadcast %10 : vector<16x1xf32> to vector<16x128xf32>
    %12 = arith.addf %9, %11 : vector<16x128xf32>
    %13 = vector.extract_strided_slice %12 {offsets = [0, 0], sizes = [8, 128], strides = [1, 1]} : vector<16x128xf32> to vector<8x128xf32>
    %14 = vector.extract_strided_slice %12 {offsets = [8, 0], sizes = [4, 128], strides = [1, 1]} : vector<16x128xf32> to vector<4x128xf32>
    %15 = vector.extract_strided_slice %12 {offsets = [12, 0], sizes = [1, 128], strides = [1, 1]} : vector<16x128xf32> to vector<1x128xf32>
    %c0_11 = arith.constant 0 : index
    %c0_12 = arith.constant 0 : index
    %16 = vector.load %arg2[%c0_11, %c0_12] : memref<2x128xf32, #tpu.memory_space<vmem>>, vector<1x128xf32>
    %c1 = arith.constant 1 : index
    %c0_13 = arith.constant 0 : index
    %17 = vector.load %arg2[%c1, %c0_13] : memref<2x128xf32, #tpu.memory_space<vmem>>, vector<1x128xf32>
    %18 = vector.extract_strided_slice %14 {offsets = [0, 0], sizes = [1, 128], strides = [1, 1]} : vector<4x128xf32> to vector<1x128xf32>
    %cst_14 = arith.constant 8.000000e+00 : f32
    %19 = vector.broadcast %cst_14 : f32 to vector<1x128xf32>
    %20 = arith.mulf %18, %19 : vector<1x128xf32>
    %21 = vector.extract_strided_slice %14 {offsets = [1, 0], sizes = [1, 128], strides = [1, 1]} : vector<4x128xf32> to vector<1x128xf32>
    %cst_15 = arith.constant 8.000000e+00 : f32
    %22 = vector.broadcast %cst_15 : f32 to vector<1x128xf32>
    %23 = arith.mulf %21, %22 : vector<1x128xf32>
    %24 = vector.extract_strided_slice %14 {offsets = [2, 0], sizes = [1, 128], strides = [1, 1]} : vector<4x128xf32> to vector<1x128xf32>
    %cst_16 = arith.constant 8.000000e+00 : f32
    %25 = vector.broadcast %cst_16 : f32 to vector<1x128xf32>
    %26 = arith.mulf %24, %25 : vector<1x128xf32>
    %27 = vector.extract_strided_slice %14 {offsets = [3, 0], sizes = [1, 128], strides = [1, 1]} : vector<4x128xf32> to vector<1x128xf32>
    %cst_17 = arith.constant 8.000000e+00 : f32
    %28 = vector.broadcast %cst_17 : f32 to vector<1x128xf32>
    %29 = arith.mulf %27, %28 : vector<1x128xf32>
    %30 = arith.addf %16, %20 : vector<1x128xf32>
    %31 = arith.addf %17, %23 : vector<1x128xf32>
    %32 = math.exp %26 : vector<1x128xf32>
    %cst_18 = arith.constant 8.000000e+00 : f32
    %33 = vector.broadcast %cst_18 : f32 to vector<1x128xf32>
    %34 = arith.mulf %32, %33 : vector<1x128xf32>
    %35 = math.exp %29 : vector<1x128xf32>
    %cst_19 = arith.constant 8.000000e+00 : f32
    %36 = vector.broadcast %cst_19 : f32 to vector<1x128xf32>
    %37 = arith.mulf %35, %36 : vector<1x128xf32>
    %cst_20 = arith.constant 5.000000e-01 : f32
    %38 = vector.broadcast %cst_20 : f32 to vector<1x128xf32>
    %39 = arith.mulf %38, %34 : vector<1x128xf32>
    %40 = arith.subf %30, %39 : vector<1x128xf32>
    %cst_21 = arith.constant 5.000000e-01 : f32
    %41 = vector.broadcast %cst_21 : f32 to vector<1x128xf32>
    %42 = arith.mulf %41, %37 : vector<1x128xf32>
    %43 = arith.subf %31, %42 : vector<1x128xf32>
    %cst_22 = arith.constant 5.000000e-01 : f32
    %44 = vector.broadcast %cst_22 : f32 to vector<1x128xf32>
    %45 = arith.mulf %44, %34 : vector<1x128xf32>
    %46 = arith.addf %30, %45 : vector<1x128xf32>
    %cst_23 = arith.constant 5.000000e-01 : f32
    %47 = vector.broadcast %cst_23 : f32 to vector<1x128xf32>
    %48 = arith.mulf %47, %37 : vector<1x128xf32>
    %49 = arith.addf %31, %48 : vector<1x128xf32>
    %50 = tpu.concatenate %40, %43, %46, %49 in 0 : vector<1x128xf32>, vector<1x128xf32>, vector<1x128xf32>, vector<1x128xf32> -> vector<4x128xf32>
    %c0_24 = arith.constant 0 : index
    %c0_25 = arith.constant 0 : index
    %51 = vector.load %arg7[%c0_24, %c0_25] : memref<4x128xf32, #tpu.memory_space<vmem>>, vector<4x128xf32>
    tpu.vector_store %arg7[%c0_24, %c0_25], %50 {strides = array<i32>} : memref<4x128xf32, #tpu.memory_space<vmem>>, vector<4x128xf32>,
    %52 = arith.negf %13 : vector<8x128xf32>
    %53 = math.exp %52 : vector<8x128xf32>
    %cst_26 = arith.constant 1.000000e+00 : f32
    %54 = vector.broadcast %cst_26 : f32 to vector<8x128xf32>
    %55 = arith.addf %54, %53 : vector<8x128xf32>
    %56 = arith.divf %54, %55 : vector<8x128xf32>
    %57 = arith.negf %15 : vector<1x128xf32>
    %58 = math.exp %57 : vector<1x128xf32>
    %cst_27 = arith.constant 1.000000e+00 : f32
    %59 = vector.broadcast %cst_27 : f32 to vector<1x128xf32>
    %60 = arith.addf %59, %58 : vector<1x128xf32>
    %61 = arith.divf %59, %60 : vector<1x128xf32>
    %62 = vector.broadcast %61 : vector<1x128xf32> to vector<8x128xf32>
    %63 = arith.mulf %56, %62 : vector<8x128xf32>
    %c0_28 = arith.constant 0 : index
    %c0_29 = arith.constant 0 : index
    %64 = vector.load %arg8[%c0_28, %c0_29] : memref<8x128xf32, #tpu.memory_space<vmem>>, vector<8x128xf32>
    tpu.vector_store %arg8[%c0_28, %c0_29], %63 {strides = array<i32>} : memref<8x128xf32, #tpu.memory_space<vmem>>, vector<8x128xf32>,
    %cst_30 = arith.constant dense<0xFF800000> : vector<128xf32>
    %65 = vector.multi_reduction <maximumf>, %63, %cst_30 [0] : vector<8x128xf32> to vector<128xf32>
    %66 = vector.shape_cast %65 : vector<128xf32> to vector<1x128xf32>
    %c0_31 = arith.constant 0 : index
    %c0_32 = arith.constant 0 : index
    %67 = vector.load %arg9[%c0_31, %c0_32] : memref<1x128xf32, #tpu.memory_space<vmem>>, vector<1x128xf32>
    tpu.vector_store %arg9[%c0_31, %c0_32], %66 {strides = array<i32>} : memref<1x128xf32, #tpu.memory_space<vmem>>, vector<1x128xf32>,
    %68 = tpu.iota {dimensions = array<i32: 0>} : vector<8x128xi32>
    %69 = arith.sitofp %68 : vector<8x128xi32> to vector<8x128xf32>
    %70 = vector.broadcast %66 : vector<1x128xf32> to vector<8x128xf32>
    %71 = arith.cmpf oeq, %63, %70 : vector<8x128xf32>
    %cst_33 = arith.constant 8.000000e+00 : f32
    %72 = vector.broadcast %cst_33 : f32 to vector<8x128xf32>
    %73 = arith.select %71, %69, %72 : vector<8x128xi1>, vector<8x128xf32>
    %cst_34 = arith.constant dense<0x7F800000> : vector<128xf32>
    %74 = vector.multi_reduction <minimumf>, %73, %cst_34 [0] : vector<8x128xf32> to vector<128xf32>
    %75 = vector.shape_cast %74 : vector<128xf32> to vector<1x128xf32>
    %76 = arith.fptosi %75 : vector<1x128xf32> to vector<1x128xi32>
    %c0_35 = arith.constant 0 : index
    %c0_36 = arith.constant 0 : index
    %77 = vector.load %arg10[%c0_35, %c0_36] : memref<1x128xi32, #tpu.memory_space<vmem>>, vector<1x128xi32>
    tpu.vector_store %arg10[%c0_35, %c0_36], %76 {strides = array<i32>} : memref<1x128xi32, #tpu.memory_space<vmem>>, vector<1x128xi32>,
    return
  }
  func.func @transform_0(%arg0: i32) -> (i32, i32) {
    %c0_i32 = arith.constant 0 : i32
    %c0_i32_0 = arith.constant 0 : i32
    return %c0_i32, %arg0 : i32, i32
  }
  func.func @transform_1(%arg0: i32) -> (i32, i32) {
    %c0_i32 = arith.constant 0 : i32
    %c0_i32_0 = arith.constant 0 : i32
    return %c0_i32, %arg0 : i32, i32
  }
  func.func @transform_2(%arg0: i32) -> (i32, i32) {
    %c0_i32 = arith.constant 0 : i32
    %c0_i32_0 = arith.constant 0 : i32
    %c0_i32_1 = arith.constant 0 : i32
    return %c0_i32, %c0_i32_0 : i32, i32
  }
  func.func @transform_3(%arg0: i32) -> (i32, i32) {
    %c0_i32 = arith.constant 0 : i32
    %c0_i32_0 = arith.constant 0 : i32
    %c0_i32_1 = arith.constant 0 : i32
    return %c0_i32, %c0_i32_0 : i32, i32
  }
  func.func @transform_4(%arg0: i32) -> (i32, i32) {
    %c0_i32 = arith.constant 0 : i32
    %c0_i32_0 = arith.constant 0 : i32
    %c0_i32_1 = arith.constant 0 : i32
    return %c0_i32, %c0_i32_0 : i32, i32
  }
  func.func @transform_5(%arg0: i32) -> (i32, i32) {
    %c0_i32 = arith.constant 0 : i32
    %c0_i32_0 = arith.constant 0 : i32
    %c0_i32_1 = arith.constant 0 : i32
    return %c0_i32, %c0_i32_0 : i32, i32
  }
  func.func @transform_6(%arg0: i32) -> (i32, i32) {
    %c0_i32 = arith.constant 0 : i32
    %c0_i32_0 = arith.constant 0 : i32
    return %c0_i32, %arg0 : i32, i32
  }
  func.func @transform_7(%arg0: i32) -> (i32, i32) {
    %c0_i32 = arith.constant 0 : i32
    %c0_i32_0 = arith.constant 0 : i32
    return %c0_i32, %arg0 : i32, i32
  }
  func.func @transform_8(%arg0: i32) -> (i32, i32) {
    %c0_i32 = arith.constant 0 : i32
    %c0_i32_0 = arith.constant 0 : i32
    return %c0_i32, %arg0 : i32, i32
  }
  func.func @transform_9(%arg0: i32) -> (i32, i32) {
    %c0_i32 = arith.constant 0 : i32
    %c0_i32_0 = arith.constant 0 : i32
    return %c0_i32, %arg0 : i32, i32
  }
}

</mosaic_0001>

<bundles_post_ra>
// kernel: tile.9
= control target key start
LH: loop header
LB: loop body
LE: loop exit
PB: predicated region body
PF: predicated region fallthrough
CT: control target
= control target key end

     0   :  { %s67_s10 = smov 56   ;;  %s68_s11 = smov 40   ;;  %vm3_vm0 = vcmask 64512   ;;  %vm9_vm1 = vcmask 523712   ;;  %vm15_vm2 = vcmask 458112   ;;  %vm21_vm3 = vcmask 392512   ;;  %s111_s0 = inlined_call_operand.vmem [shape: f32[8,8], index: 0, kind: input, shape index: {}]   ;;  %s112_s1 = inlined_call_operand.vmem [shape: f32[64], index: 1, kind: output, shape index: {}]  }
   0x1   :  { %v53_v0 = vld [vmem:[%s111_s0 + $0x7] sm:$0x1]   ;;  %v55_v1 = vld [vmem:[%s111_s0 + $0x5] sm:$0x1]   ;;  %v54_v2 = vld [vmem:[%s111_s0 + $0x6] sm:$0x1]  }
   0x2   :  { %7 = vrot.lane.b32.xlu0 %v53_v0, %s67_s10  ;;  %19 = vrot.lane.b32.xlu1 %v55_v1, %s68_s11  ;;  %v56_v3 = vld [vmem:[%s111_s0 + $0x4] sm:$0x1]   ;;  %v2_v4 = vld [vmem:[%s111_s0] sm:$0x1]   ;;  %s69_s18 = smov 48   ;;  %s70_s19 = smov 32  }
   0x3   :  { %4 = vst.msk [vmem:[#allocation0] sm:$0x1] %vm3_vm0, %v2_v4   ;;  %v57_v5 = vld [vmem:[%s111_s0 + $0x3] sm:$0x1]   ;;  %v58_v6 = vld [vmem:[%s111_s0 + $0x2] sm:$0x1]  }
   0x4   :  { %s71_s24 = smov 24   ;;  %s72_s25 = smov 16   ;;  %v59_v7 = vld [vmem:[%s111_s0 + $0x1] sm:$0x1]   ;;  %vm27_vm4 = vcmask 326912   ;;  %vm33_vm5 = vcmask 261312  }
   0x5   :  { %s73_s0 = smov 8   ;;  %vm39_vm6 = vcmask 195712   ;;  %vm45_vm7 = vcmask 130112  }
   0x6   :  { %13 = vrot.lane.b32.xlu0 %v54_v2, %s69_s18  ;;  %25 = vrot.lane.b32.xlu1 %v56_v3, %s70_s19 }
   0xa   :  { %31 = vrot.lane.b32.xlu0 %v57_v5, %s71_s24  ;;  %37 = vrot.lane.b32.xlu1 %v58_v6, %s72_s25 }
   0xe   :  { %43 = vrot.lane.b32.xlu0 %v59_v7, %s73_s0 }
  0x74   :  { %v8_v8 = vpop.permute.xlu0 %7   ;;  %v20_v9 = vpop.permute.xlu1 %19  }
  0x75   :  { %10 = vst.msk [vmem:[#allocation0] sm:$0x1] %vm9_vm1, %v8_v8  }
  0x78   :  { %v14_v10 = vpop.permute.xlu0 %13   ;;  %v26_v11 = vpop.permute.xlu1 %25  }
  0x79   :  { %16 = vst.msk [vmem:[#allocation0] sm:$0x1] %vm15_vm2, %v14_v10  }
  0x7a   :  { %22 = vst.msk [vmem:[#allocation0] sm:$0x1] %vm21_vm3, %v20_v9  }
  0x7b   :  { %28 = vst.msk [vmem:[#allocation0] sm:$0x1] %vm27_vm4, %v26_v11  }
  0x7c   :  { %v32_v12 = vpop.permute.xlu0 %31   ;;  %v38_v13 = vpop.permute.xlu1 %37  }
  0x7d   :  { %34 = vst.msk [vmem:[#allocation0] sm:$0x1] %vm33_vm5, %v32_v12  }
  0x7e   :  { %40 = vst.msk [vmem:[#allocation0] sm:$0x1] %vm39_vm6, %v38_v13  }
  0x80   :  { %v44_v14 = vpop.permute.xlu0 %43  }
  0x81   :  { %46 = vst.msk [vmem:[#allocation0] sm:$0x1] %vm45_vm7, %v44_v14  }
  0x88   :  { %v50_v15 = vld [vmem:[#allocation0] sm:$0x1] }
  0x89   :  { %52 = vst [vmem:[%s112_s1] sm:$0x1] %v50_v15 }

// kernel: tile.10
= control target key start
LH: loop header
LB: loop body
LE: loop exit
PB: predicated region body
PF: predicated region fallthrough
CT: control target
= control target key end

     0   :  { %s22_s0 = inlined_call_operand.vmem [shape: f32[64], index: 0, kind: input, shape index: {}]   ;;  %s23_s1 = inlined_call_operand.vmem [shape: f32[2,64], index: 1, kind: output, shape index: {}]  }
   0x1   :  { %v4_v0 = vld [vmem:[%s22_s0] ss:$0 sm:$0xff] }
   0x2   :  { %5 = vst [vmem:[%s23_s1] sm:$0x3] %v4_v0 }

// kernel: tile.14
= control target key start
LH: loop header
LB: loop body
LE: loop exit
PB: predicated region body
PF: predicated region fallthrough
CT: control target
= control target key end

     0   :  { %vm7_vm0 = vcmask 523264   ;;  %vm13_vm1 = vcmask 1048064   ;;  %s39_s0 = inlined_call_operand.vmem [shape: f32[2,64], index: 0, kind: input, shape index: {}]   ;;  %s40_s1 = inlined_call_operand.vmem [shape: f32[1,128], index: 1, kind: output, shape index: {}]  }
   0x1   :  { %v4_v0 = vld [vmem:[%s39_s0] sm:$0x3]  ;;  %s22_s0 = smov 64  }
   0x2   :  { %5 = vst [vmem:[#allocation1] sm:$0x3] %v4_v0 }
   0x9   :  { %v10_v1 = vld [vmem:[#allocation1 + $0x1] sm:$0x1]   ;;  %v6_v2 = vld [vmem:[#allocation1] sm:$0x1]  }
   0xa   :  { %11 = vrot.lane.b32.xlu0 %v10_v1, %s22_s0  ;;  %8 = vst.msk [vmem:[#allocation0] sm:$0x1] %vm7_vm0, %v6_v2  }
  0x7c   :  { %v12_v3 = vpop.permute.xlu0 %11  }
  0x7d   :  { %14 = vst.msk [vmem:[#allocation0] sm:$0x1] %vm13_vm1, %v12_v3  }
  0x84   :  { %v18_v4 = vld [vmem:[#allocation0] sm:$0x1] }
  0x85   :  { %20 = vst [vmem:[%s40_s1] sm:$0x1] %v18_v4 }

// kernel: squeeze.2
= control target key start
LH: loop header
LB: loop body
LE: loop exit
PB: predicated region body
PF: predicated region fallthrough
CT: control target
= control target key end

     0   :  { %vm7_vm0 = vcmask 523264   ;;  %s39_s0 = inlined_call_operand.vmem [shape: f32[128], index: 0, kind: input, shape index: {}]   ;;  %s40_s1 = inlined_call_operand.vmem [shape: f32[2,64], index: 1, kind: output, shape index: {}]  }
   0x1   :  { %v4_v0 = vld [vmem:[%s39_s0] sm:$0x1]  ;;  %s22_s0 = smov 64  }
   0x2   :  { %5 = vst [vmem:[#allocation1] sm:$0x1] %v4_v0 }
   0x9   :  { %v9_v1 = vld [vmem:[#allocation1] sm:$0x1]  }
   0xa   :  { %v6_v2 = vld [vmem:[#allocation1] sm:$0x1]   ;;  %10 = vrot.lane.b32.xlu0 %v9_v1, %s22_s0 }
   0xb   :  { %8 = vst.msk [vmem:[#allocation0] sm:$0x1] %vm7_vm0, %v6_v2  }
  0x7c   :  { %v11_v3 = vpop.permute.xlu0 %10  }
  0x7d   :  { %14 = vst.msk [vmem:[#allocation0 + $0x1] sm:$0x1] %vm7_vm0, %v11_v3  }
  0x84   :  { %v18_v4 = vld [vmem:[#allocation0] sm:$0x3] }
  0x85   :  { %20 = vst [vmem:[%s40_s1] sm:$0x3] %v18_v4 }

// kernel: squeeze.3
= control target key start
LH: loop header
LB: loop body
LE: loop exit
PB: predicated region body
PF: predicated region fallthrough
CT: control target
= control target key end

     0   :  { %s85_s0 = inlined_call_operand.vmem [shape: s32[128], index: 0, kind: input, shape index: {}]   ;;  %s86_s1 = inlined_call_operand.hbm [shape: s32[2,64], index: 1, kind: output, shape index: {}]  }
   0x1   :  { %v5_v0 = vld [vmem:[%s85_s0] sm:$0x1] }
   0x2   :  { %2 = vsyncpa [#allocation1], 0  ;;  %6 = vst [vmem:[#allocation3] sm:$0x1] %v5_v0  ;;  %vm8_vm0 = vcmask 523264   ;;  %s58_s0 = smov 64  }
   0x3   :  { %s59_s8 = smov [#allocation0]  }
   0x4   :  { %s26_s9 = sshll.u32 %s59_s8, 4  ;;  %s27_s9 = int_to_ptr.vmem [resolvable:$true] %s26_s9 }
   0x5   :  { %s34_s10 = scalar_lea.vmem %s27_s9, 32  ;;  %p39_p1 = scmp.lt.s32.totalorder %s27_s9, %s27_s9 }
   0x6   :  { %p35_p0 = scmp.ne.s32.totalorder %s27_s9, %s34_s10  ;;  %p40_p2 = scmp.lt.s32.totalorder %s34_s10, %s34_s10 }
   0x8   :  { %p41_p3 = por %p40_p2, %p39_p1 }
   0x9   :  { %v10_v1 = vld [vmem:[#allocation3] sm:$0x1]  }
   0xa   :  { %v7_v2 = vld [vmem:[#allocation3] sm:$0x1]   ;;  %11 = vrot.lane.b32.xlu0 %v10_v1, %s58_s0  ;;  %p42_p4 = pnand %p41_p3, %p35_p0 }
   0xb   :  { %9 = vst.msk [vmem:[#allocation2] sm:$0x1] %vm8_vm0, %v7_v2  }
  0x7c   :  { %v12_v3 = vpop.permute.xlu0 %11  }
  0x7d   :  { %15 = vst.msk [vmem:[#allocation2 + $0x1] sm:$0x1] %vm8_vm0, %v12_v3  }
  0x84   :  { %v19_v4 = vld [vmem:[#allocation2] sm:$0x3] }
  0x85   :  { %21 = vst [vmem:[#allocation0] sm:$0x3] %v19_v4 }
  0x86   :  { %45 = shalt.err (!%p42_p4)
}
  0x87   :  { %s46_s13 = scalar_lea.hbm %s86_s1, 32 }
  0x88   :  { %p47_p5 = scmp.ne.s32.totalorder %s86_s1, %s46_s13  ;;  %p50_p6 = scmp.lt.u32.totalorder %s46_s13, %s86_s1 }
  0x8a   :  { %p52_p7 = pnand %p50_p6, %p47_p5 }
  0x8c   :  { %55 = shalt.err (!%p52_p7)
}
  0x8d   :  { %29 = dma.vmem_to_hbm [thread:$0]  %s27_s9, 32, %s86_s1, [#allocation1]  }
  0x8e   :  { %56 = dma.done.wait [#allocation1], 32  }
  0x8f   :  { %57 = vsyncadd [#allocation1], 4294967264 }
  0x90   :  { %31 = vsyncpa [#allocation1], 1 }

// kernel: hybrid_detection_forward.1
= control target key start
LH: loop header
LB: loop body
LE: loop exit
PB: predicated region body
PF: predicated region fallthrough
CT: control target
= control target key end

     0   :  { %vm59_vm0 = vcmask 261120   ;;  %v425_v3 = vmov 0   ;;  %v305_v51 = vlaneseq  ;;  %vm286_vm1 = vcmask 1040384   ;;  %s548_s0 = inlined_call_operand.vmem [shape: f32[32,128], index: 0, kind: input, shape index: {}]   ;;  %s549_s2 = inlined_call_operand.vmem [shape: f32[32,32], index: 2, kind: input, shape index: {}]   ;;  %s550_s3 = inlined_call_operand.vmem [shape: f32[32,1], index: 3, kind: input, shape index: {}]   ;;  %s551_s5 = inlined_call_operand.vmem [shape: f32[16,1], index: 5, kind: input, shape index: {}]   ;;  %s552_s4 = inlined_call_operand.vmem [shape: f32[16,32], index: 4, kind: input, shape index: {}]   ;;  %s553_s1 = inlined_call_operand.vmem [shape: f32[2,128], index: 1, kind: input, shape index: {}]   ;;  %s554_s6 = inlined_call_operand.vmem [shape: f32[4,128], index: 6, kind: output, shape index: {0}]   ;;  %s555_s7 = inlined_call_operand.vmem [shape: f32[8,128], index: 7, kind: output, shape index: {1}]   ;;  %s556_s8 = inlined_call_operand.vmem [shape: f32[1,128], index: 8, kind: output, shape index: {2}]   ;;  %s557_s9 = inlined_call_operand.vmem [shape: s32[1,128], index: 9, kind: output, shape index: {3}]  }
   0x1   :  { %v31_v0 = vld [vmem:[%s548_s0] sm:$0xff]  ;;  %v32_v1 = vld [vmem:[%s548_s0 + $0x8] sm:$0xff]  ;;  %v33_v2 = vld [vmem:[%s548_s0 + $0x10] sm:$0xff]  ;;  %413 = vset.pattern.permute.xlu0 %v425_v3  ;;  %414 = vset.pattern.permute.xlu1 %v425_v3  ;;  %vm288_vm2 = vcmask 1041408   ;;  %vm290_vm3 = vcmask 1042432  }
   0x2   :  { %v394_v4 = vpack.c.bf16 %v32_v1, %v31_v0  ;;  %v34_v5 = vld [vmem:[%s548_s0 + $0x18] sm:$0xff]  ;;  %v27_v6 = vld [vmem:[%s549_s2] sm:$0xff]  ;;  %v37_v9 = vld [vmem:[%s550_s3 + $0x10] sm:$0xff]  ;;  %v306_v58 = vshrl.u32 %v305_v51, 7 }
   0x3   :  { %v398_v7 = vpack.c.bf16 %v34_v5, %v33_v2  ;;  %377 = vmatprep.mubr.msk.f32.mxu0 %vm59_vm0, %v27_v6  ;;  %v35_v8 = vld [vmem:[%s550_s3] sm:$0xff]  ;;  %51 = vperm.xlu1 %414, %v37_v9   ;;  %v36_v10 = vld [vmem:[%s550_s3 + $0x8] sm:$0xff]  ;;  %v38_v11 = vld [vmem:[%s550_s3 + $0x18] sm:$0xff] }
   0x4   :  { %395 = vmatprep.subr.bf16.mxu0 %v394_v4  ;;  %41 = vperm.xlu0 %413, %v35_v8   ;;  %v28_v12 = vld [vmem:[%s549_s2 + $0x8] sm:$0xff]  ;;  %v29_v14 = vld [vmem:[%s549_s2 + $0x10] sm:$0xff]  ;;  %v163_v15 = vld [vmem:[%s551_s5] sm:$0xff]  ;;  %v307_v2 = vsub.s32 4, %v306_v58 }
   0x5   :  { %397 = vmatpush3.bf16.msra.mxu0 %v394_v4  ;;  %v164_v13 = vld [vmem:[%s551_s5 + $0x8] sm:$0xff]  ;;  %v30_v16 = vld [vmem:[%s549_s2 + $0x18] sm:$0xff]  ;;  %v161_v17 = vld [vmem:[%s552_s4] sm:$0xff] }
   0x6   :  { %399 = vmatprep.subr.bf16.mxu0 %v398_v7  ;;  %391 = vmatprep.mubr.msk.f32.mxu1 %vm59_vm0, %v161_v17  ;;  %v162_v36 = vld [vmem:[%s552_s4 + $0x8] sm:$0xff]  ;;  %v256_v55 = vld [vmem:[%s553_s1] sm:$0x1]  ;;  %v257_v56 = vld [vmem:[%s553_s1 + $0x1] sm:$0x1] }
   0x7   :  { %56 = vperm.xlu1 %414, %v38_v11  }
   0x8   :  { %46 = vperm.xlu0 %413, %v36_v10  }
   0x9   :  { %401 = vmatpush3.bf16.msra.mxu0 %v398_v7 }
   0xb   :  { %167 = vperm.xlu1 %414, %v163_v15  }
   0xc   :  { %378 = vmatmul.mubr.msk.f32.vlgmr.msra.gmra.mrb[0].mxu0 %vm59_vm0, %v28_v12  ;;  %172 = vperm.xlu0 %413, %v164_v13  }
   0xd   :  { %380 = vmatprep.mubr.msk.f32.mxu0 %vm59_vm0, %v29_v14 }
  0x10   :  { %381 = vmatmul.mubr.msk.f32.gmra.mrb[2].mxu0 %vm59_vm0, %v30_v16 }
  0x82   :  { %v52_v19 = vpop.permute.xlu1 %51 }
  0x83   :  { %v42_v18 = vpop.permute.xlu0 %41 }
  0x86   :  { %v57_v26 = vpop.permute.xlu1 %56 }
  0x87   :  { %v47_v20 = vpop.permute.xlu0 %46 }
  0x8a   :  { %v168_v39 = vpop.permute.xlu1 %167 }
  0x8b   :  { %v173_v37 = vpop.permute.xlu0 %172 }
  0xdf   :  { %v379_v21 = vpop.f32.mrb[0].mxu0 }
  0xe0   :  { %v144_v22 = vadd.f32 %v379_v21, %v47_v20  ;;  %v138_v23 = vpop.f32.mrb[1].mxu0 }
  0xe1   :  { %v139_v24 = vadd.f32 %v138_v23, %v42_v18 }
  0xe2   :  { %v158_v25 = vmax.f32 %v144_v22, 0.0 }
  0xe3   :  { %v157_v27 = vmax.f32 %v139_v24, 0.0  ;;  %v382_v28 = vpop.f32.mrb[2].mxu0 }
  0xe4   :  { %v154_v29 = vadd.f32 %v382_v28, %v57_v26  ;;  %v148_v30 = vpop.f32.mrb[3].mxu0 }
  0xe5   :  { %v149_v31 = vadd.f32 %v148_v30, %v52_v19  ;;  %v402_v32 = vpack.c.bf16 %v158_v25, %v157_v27  ;;  %v320_v19 = vcvt.s32.f32 %v306_v58 }
  0xe6   :  { %v160_v33 = vmax.f32 %v154_v29, 0.0 }
  0xe7   :  { %v159_v34 = vmax.f32 %v149_v31, 0.0  ;;  %403 = vmatprep.subr.bf16.mxu1 %v402_v32 }
  0xe8   :  { %405 = vmatpush3.bf16.msra.mxu1 %v402_v32 }
  0xe9   :  { %v406_v35 = vpack.c.bf16 %v160_v33, %v159_v34 }
  0xeb   :  { %407 = vmatprep.subr.bf16.mxu1 %v406_v35 }
  0xec   :  { %409 = vmatpush3.bf16.msra.mxu1 %v406_v35 }
  0xef   :  { %392 = vmatmul.mubr.msk.f32.vlgmr.msra.gmra.mrb[0].mxu1 %vm59_vm0, %v162_v36 }
 0x1c2   :  { %v393_v38 = vpop.f32.mrb[0].mxu1 }
 0x1c3   :  { %v253_v40 = vadd.f32 %v393_v38, %v173_v37  ;;  %v247_v41 = vpop.f32.mrb[1].mxu1 }
 0x1c4   :  { %v248_v42 = vadd.f32 %v247_v41, %v168_v39 }
 0x1c5   :  { %v258_v43 = vmul.f32 8.0, %v253_v40  ;;  %v354_v44 = vmul.f32 -1.442695, %v253_v40 }
 0x1c6   :  { %v353_v45 = vmul.f32 -1.442695, %v248_v42 }
 0x1c7   :  { %v264_v46 = vmul.f32 1.442695, %v258_v43  ;;  %415 = vpow2.f32 %v354_v44  ;;  %v261_v53 = vrot.slane %v258_v43, 1  ;;  %v259_v59 = vadd.f32 %v258_v43, %v256_v55 }
 0x1c8   :  { %417 = vpow2.f32 %v353_v45 }
 0x1c9   :  { %419 = vpow2.f32 %v264_v46  ;;  %v263_v60 = vadd.f32 %v261_v53, %v257_v56 }
 0x1d1   :  { %v416_v47 = vpop.eup %415 }
 0x1d2   :  { %v418_v48 = vpop.eup %417  ;;  %v302_v49 = vadd.f32 1.0, %v416_v47 }
 0x1d3   :  { %v420_v50 = vpop.eup %419  ;;  %v296_v52 = vadd.f32 1.0, %v418_v48 }
 0x1d4   :  { %v266_v54 = vmul.f32 8.0, %v420_v50  ;;  %421 = vrcp.f32 %v302_v49 }
 0x1d5   :  { %423 = vrcp.f32 %v296_v52 }
 0x1d6   :  { %v267_v57 = vmul.f32 0.5, %v266_v54 }
 0x1d8   :  { %v269_v61 = vrot.slane %v267_v57, 2  ;;  %v272_v62 = vrot.slane %v267_v57, 3 }
 0x1da   :  { %v274_v63 = vsub.f32 %v263_v60, %v272_v62  ;;  %v275_v0 = vadd.f32 %v269_v61, %v259_v59  ;;  %v276_v1 = vadd.f32 %v272_v62, %v263_v60  ;;  %v271_v3 = vsub.f32 %v259_v59, %v269_v61 }
 0x1dc   :  { %v278_v4 = vrot.slane %v274_v63, 7  ;;  %v281_v5 = vrot.slane %v275_v0, 6  ;;  %v284_v7 = vrot.slane %v276_v1, 5 }
 0x1de   :  { %v422_v6 = vpop.eup %421  ;;  %v287_v8 = vsel %vm286_vm1, %v271_v3, %v278_v4 }
 0x1df   :  { %v424_v9 = vpop.eup %423  ;;  %v289_v10 = vsel %vm288_vm2, %v287_v8, %v281_v5  ;;  %v308_v11 = vrot.slane %v422_v6, %v307_v2 }
 0x1e0   :  { %v291_v12 = vsel %vm290_vm3, %v289_v10, %v284_v7 }
 0x1e1   :  { %292 = vst [vmem:[%s554_s6] sm:$0xf] %v291_v12  ;;  %v309_v13 = vmul.f32 %v424_v9, %v308_v11 }
 0x1e3   :  { %310 = vst [vmem:[%s555_s7] sm:$0xff] %v309_v13  ;;  %v311_v14 = vrot.slane %v309_v13, 4 }
 0x1e5   :  { %v312_v15 = vmax.f32 %v309_v13, %v311_v14 }
 0x1e7   :  { %v313_v16 = vrot.slane %v312_v15, 2 }
 0x1e9   :  { %v314_v17 = vmax.f32 %v312_v15, %v313_v16 }
 0x1eb   :  { %v315_v18 = vrot.slane %v314_v17, 1 }
 0x1ed   :  { %v316_v20 = vmax.f32 %v314_v17, %v315_v18 }
 0x1ef   :  { %317 = vst [vmem:[%s556_s8] sm:$0x1] %v316_v20  ;;  %vm321_vm4 = vcmp.eq.f32.partialorder %v309_v13, %v316_v20 }
 0x1f0   :  { %v322_v21 = vsel %vm321_vm4, %v320_v19, 8.0 }
 0x1f1   :  { %v323_v22 = vrot.slane %v322_v21, 4 }
 0x1f3   :  { %v324_v23 = vmin.f32 %v322_v21, %v323_v22 }
 0x1f5   :  { %v325_v24 = vrot.slane %v324_v23, 2 }
 0x1f7   :  { %v326_v25 = vmin.f32 %v324_v23, %v325_v24 }
 0x1f9   :  { %v327_v26 = vrot.slane %v326_v25, 1 }
 0x1fb   :  { %v328_v27 = vmin.f32 %v326_v25, %v327_v26 }
 0x1fd   :  { %v410_v28 = vtrunc.f32 %v328_v27 }
 0x1ff   :  { %v411_v29 = vcvt.f32.s32 %v410_v28 }
 0x201   :  { %330 = vst [vmem:[%s557_s9] sm:$0x1] %v411_v29 }

</bundles_post_ra>
